<compile_context>
chip_gen: v5e
topology: v5e:2x2
jax: 0.10.0
libtpu: 0.0.40
codegen_flags: <defaults>
</compile_context>

<pallas_src>
import functools

import jax
import jax.numpy as jnp
from jax.experimental import pallas as pl
from jax.experimental.pallas import tpu as pltpu

_MIB = 1024 * 1024


def _rmsnorm_kernel(x_ref, w_ref, o_ref, *, eps, inv_dim):
    # x_ref: (tile_rows, dim), w_ref: (1, dim), o_ref: (tile_rows, dim)
    x32 = x_ref[...].astype(jnp.float32)                        # x.float()
    # mean via sum * (1/dim): constant multiply instead of per-row divide.
    ms = jnp.sum(x32 * x32, axis=-1, keepdims=True) * inv_dim   # pow(2).mean(-1)
    inv = jax.lax.rsqrt(ms + eps)                                # rsqrt -> EUP
    normed = x32 * inv
    if x_ref.dtype != jnp.float32:
        # Match torch: _norm(x.float()).type_as(x) round-trips through x.dtype
        # before multiplying by the (f32) weight.
        normed = normed.astype(x_ref.dtype)
    o_ref[...] = (normed * w_ref[...]).astype(o_ref.dtype)       # promotes if needed


def _cdiv(a, b):
    return -(-a // b)


def _align_up(v, a):
    return _cdiv(v, a) * a


def _tpu_hw_info():
    """Return (vmem_capacity_bytes, num_tensorcores) with safe fallbacks."""
    vmem_cap = 128 * _MIB
    num_tc = 1
    try:
        info = pltpu.get_tpu_info()
        vmem_cap = int(getattr(info, "vmem_capacity_bytes", vmem_cap))
    except Exception:
        pass
    try:
        kind = jax.devices()[0].device_kind.lower()
        if "v7" in kind:
            num_tc = 2
            vmem_cap = min(vmem_cap, 64 * _MIB)   # 64 MiB per TensorCore on v7x
    except Exception:
        pass
    return vmem_cap, num_tc


def _plan_tiles(rows, dim, in_itemsize, out_itemsize, vmem_cap, num_tc):
    """Pick (tile_rows, vmem_limit_bytes) from the true per-row working set."""
    # Sublane alignment for the input dtype: 8 (f32), 16 (bf16), 32 (8-bit).
    sublane = max(8, 32 // in_itemsize)

    # Double-buffered input + output tiles plus ~8 B/elem of f32 temporaries.
    per_row_bytes = dim * (2 * in_itemsize + 2 * out_itemsize + 8)

    # Scoped-VMEM ceiling: ~48 MiB on v7x (64 MiB part), ~96 MiB on v5e/v6e
    # (128 MiB parts). Always leave >= 16 MiB headroom for Mosaic scratch.
    limit_cap = max(32 * _MIB, min(96 * _MIB, vmem_cap - 16 * _MIB))
    budget = int(0.8 * limit_cap)   # streaming working-set budget under the limit

    tile = max(sublane, (budget // max(1, per_row_bytes)) // sublane * sublane)

    if rows <= sublane:
        tile = rows                                   # full-extent block, always legal
    elif tile >= rows:
        if num_tc >= 2 and rows >= 2 * sublane:
            # Small problem on a 2-TC chip: split into 2 blocks for megacore.
            tile = _align_up(_cdiv(rows, 2), sublane)
            if tile >= rows:
                tile = rows
        else:
            tile = rows                               # single-TC: one block, no overhead
    else:
        # Multi-block case on a 2-TC chip: prefer an even block count.
        nblocks = _cdiv(rows, tile)
        if num_tc >= 2 and nblocks % 2 == 1:
            new_tile = max(sublane, _align_up(_cdiv(rows, nblocks + 1), sublane))
            if new_tile < rows and _cdiv(rows, new_tile) % 2 == 0:
                tile = new_tile

    # VMEM limit covering the actual footprint (tile may be < budget-sized).
    work_bytes = tile * per_row_bytes + dim * (4 + out_itemsize) + 1 * _MIB
    vmem_limit = int(min(limit_cap, max(32 * _MIB, work_bytes)))
    return tile, vmem_limit


def rmsnorm(x, weight, eps=1e-6, tile_rows=None):
    """RMSNorm over the last axis of x, scaled by `weight` (shape (dim,))."""
    orig_shape = x.shape
    dim = orig_shape[-1]
    rows = 1
    for s in orig_shape[:-1]:
        rows *= s

    x2d = x.reshape(rows, dim)
    w2d = weight.reshape(1, dim)

    # Output dtype follows torch promotion of normed (x.dtype) with the weight.
    out_dtype = jnp.promote_types(x.dtype, weight.dtype)

    in_itemsize = jnp.dtype(x.dtype).itemsize
    out_itemsize = jnp.dtype(out_dtype).itemsize
    w_itemsize = jnp.dtype(weight.dtype).itemsize

    vmem_cap, num_tc = _tpu_hw_info()
    auto_tile, vmem_limit = _plan_tiles(
        rows, dim, in_itemsize, out_itemsize, vmem_cap, num_tc)
    if tile_rows is None:
        tile_rows = auto_tile

    grid = (pl.cdiv(rows, tile_rows),)   # tail block is masked by Pallas

    kernel = functools.partial(_rmsnorm_kernel, eps=float(eps), inv_dim=1.0 / dim)

    cost = pl.CostEstimate(
        flops=4 * rows * dim,
        transcendentals=rows,
        bytes_accessed=rows * dim * (in_itemsize + out_itemsize) + dim * w_itemsize,
    )

    out2d = pl.pallas_call(
        kernel,
        out_shape=jax.ShapeDtypeStruct((rows, dim), out_dtype),
        grid_spec=pltpu.PrefetchScalarGridSpec(
            num_scalar_prefetch=0,
            grid=grid,
            in_specs=[
                pl.BlockSpec((tile_rows, dim), lambda i: (i, 0)),
                pl.BlockSpec((1, dim), lambda i: (0, 0)),   # resident weight row
            ],
            out_specs=pl.BlockSpec((tile_rows, dim), lambda i: (i, 0)),
        ),
        compiler_params=pltpu.CompilerParams(
            dimension_semantics=("parallel",),
            vmem_limit_bytes=vmem_limit,
        ),
        cost_estimate=cost,
    )(x2d, w2d)

    return out2d.reshape(orig_shape[:-1] + (dim,))


def rmsnorm_ref(x, weight, eps=1e-6):
    x32 = x.astype(jnp.float32)
    normed = x32 * jax.lax.rsqrt(jnp.mean(x32 * x32, axis=-1, keepdims=True) + eps)
    return normed.astype(x.dtype) * weight


if __name__ == "__main__":
    key = jax.random.PRNGKey(0)
    batch, seq, hidden = 2, 8, 32

    # Main test: f32 input, weight init = torch.ones(dim) (RMSNorm.__init__).
    x = jax.random.normal(key, (batch, seq, hidden), dtype=jnp.float32)
    weight = jnp.ones((hidden,), dtype=jnp.float32)

    out = rmsnorm(x, weight, eps=1e-6)
    out = jax.block_until_ready(out)

    ref = rmsnorm_ref(x, weight, eps=1e-6)
    assert out.shape == x.shape and out.dtype == ref.dtype
    assert jnp.allclose(out, ref, atol=1e-5, rtol=1e-5)

    # Secondary: non-divisible row count exercises the cdiv grid + masked tail.
    k1, k2 = jax.random.split(key)
    x_odd = jax.random.normal(k1, (3, 5, hidden), dtype=jnp.float32)
    out_odd = jax.block_until_ready(rmsnorm(x_odd, weight))
    assert jnp.allclose(out_odd, rmsnorm_ref(x_odd, weight), atol=1e-5, rtol=1e-5)

    # Secondary: bf16 input with f32 weight (torch-style .type_as round-trip).
    x_bf16 = jax.random.normal(k2, (batch, seq, hidden), dtype=jnp.bfloat16)
    w_rand = jax.random.normal(key, (hidden,), dtype=jnp.float32)
    out_bf16 = jax.block_until_ready(rmsnorm(x_bf16, w_rand))
    ref_bf16 = rmsnorm_ref(x_bf16, w_rand)
    assert out_bf16.dtype == ref_bf16.dtype
    assert jnp.allclose(out_bf16, ref_bf16, atol=5e-2, rtol=5e-2)

    print("KERNEL_OK")
</pallas_src>

<mosaic_0001>
module attributes {stable_mosaic.version = 11 : i64} {
  func.func @_rmsnorm_kernel(%arg0: i32, %arg1: memref<16x32xf32, #tpu.memory_space<vmem>>, %arg2: memref<1x32xf32, #tpu.memory_space<vmem>>, %arg3: memref<16x32xf32, #tpu.memory_space<vmem>>) attributes {dimension_semantics = [#tpu.dimension_semantics<parallel>], iteration_bounds = array<i64: 1>, scalar_prefetch = 0 : i64, scratch_operands = 0 : i64, tpu.core_type = #tpu.core_type<tc>, window_params = [{transform_indices = @transform_0, window_bounds = array<i64: 16, 32>}, {pipeline_mode = #tpu.pipeline_mode<synchronous>, transform_indices = @transform_1, window_bounds = array<i64: 1, 32>}, {transform_indices = @transform_2, window_bounds = array<i64: 16, 32>}]} {
    %c0 = arith.constant 0 : index
    %c0_0 = arith.constant 0 : index
    %0 = vector.load %arg1[%c0, %c0_0] : memref<16x32xf32, #tpu.memory_space<vmem>>, vector<16x32xf32>
    %1 = arith.mulf %0, %0 : vector<16x32xf32>
    %cst = arith.constant dense<0.000000e+00> : vector<16xf32>
    %2 = vector.multi_reduction <add>, %1, %cst [1] : vector<16x32xf32> to vector<16xf32>
    %3 = vector.shape_cast %2 : vector<16xf32> to vector<16x1xf32>
    %cst_1 = arith.constant 3.125000e-02 : f32
    %4 = vector.broadcast %cst_1 : f32 to vector<16x1xf32>
    %5 = arith.mulf %3, %4 : vector<16x1xf32>
    %cst_2 = arith.constant 9.99999997E-7 : f32
    %6 = vector.broadcast %cst_2 : f32 to vector<16x1xf32>
    %7 = arith.addf %5, %6 : vector<16x1xf32>
    %8 = math.rsqrt %7 : vector<16x1xf32>
    %9 = vector.broadcast %8 : vector<16x1xf32> to vector<16x32xf32>
    %10 = arith.mulf %0, %9 : vector<16x32xf32>
    %c0_3 = arith.constant 0 : index
    %c0_4 = arith.constant 0 : index
    %11 = vector.load %arg2[%c0_3, %c0_4] : memref<1x32xf32, #tpu.memory_space<vmem>>, vector<1x32xf32>
    %12 = vector.broadcast %11 : vector<1x32xf32> to vector<16x32xf32>
    %13 = arith.mulf %10, %12 : vector<16x32xf32>
    %c0_5 = arith.constant 0 : index
    %c0_6 = arith.constant 0 : index
    %14 = vector.load %arg3[%c0_5, %c0_6] : memref<16x32xf32, #tpu.memory_space<vmem>>, vector<16x32xf32>
    tpu.vector_store %arg3[%c0_5, %c0_6], %13 {strides = array<i32>} : memref<16x32xf32, #tpu.memory_space<vmem>>, vector<16x32xf32>,
    return
  }
  func.func @transform_0(%arg0: i32) -> (i32, i32) {
    %c0_i32 = arith.constant 0 : i32
    %c0_i32_0 = arith.constant 0 : i32
    return %arg0, %c0_i32 : i32, i32
  }
  func.func @transform_1(%arg0: i32) -> (i32, i32) {
    %c0_i32 = arith.constant 0 : i32
    %c0_i32_0 = arith.constant 0 : i32
    %c0_i32_1 = arith.constant 0 : i32
    return %c0_i32, %c0_i32_0 : i32, i32
  }
  func.func @transform_2(%arg0: i32) -> (i32, i32) {
    %c0_i32 = arith.constant 0 : i32
    %c0_i32_0 = arith.constant 0 : i32
    return %arg0, %c0_i32 : i32, i32
  }
}

</mosaic_0001>

<bundles_post_ra>
// kernel: tpu_custom_call.1
= control target key start
LH: loop header
LB: loop body
LE: loop exit
PB: predicated region body
PF: predicated region fallthrough
CT: control target
= control target key end

     0   :  { %7 = vsyncpa [#allocation3], 0  ;;  %s234_s0 = inlined_call_operand.hbm [shape: f32[16,32], index: 0, kind: input, shape index: {}]   ;;  %s235_s1 = inlined_call_operand.hbm [shape: f32[1,32], index: 1, kind: input, shape index: {}]   ;;  %s236_s2 = inlined_call_operand.hbm [shape: f32[16,32], index: 2, kind: output, shape index: {}]  }
   0x1   :  { %8 = vsyncpa [#allocation6], 0 }
   0x2   :  { %9 = vsyncpa [#allocation4], 0  ;;  %s14_s11 = sshll.u32 %s234_s0, 4  ;;  %s195_s12 = smov [#allocation2]   ;;  %s15_s11 = int_to_ptr.hbm [resolvable:$true] %s14_s11 }
   0x3   :  { %s16_s13 = sshll.u32 %s195_s12, 4  ;;  %s28_s16 = sshll.u32 %s235_s1, 4  ;;  %s17_s13 = int_to_ptr.vmem [resolvable:$true] %s16_s13  ;;  %s29_s16 = int_to_ptr.hbm [resolvable:$true] %s28_s16 }
   0x4   :  { %s196_s17 = smov 128   ;;  %s197_s18 = smov 8  }
   0x5   :  { %22 = dma.hbm_to_vmem [thread:$0]  %s15_s11, 256, %s17_s13, [#allocation3], %s196_s17, %s196_s17, %s197_s18  }
   0x6   :  { %s198_s19 = smov [#allocation5]  }
   0x7   :  { %s30_s20 = sshll.u32 %s198_s19, 4  ;;  %s31_s20 = int_to_ptr.vmem [resolvable:$true] %s30_s20 }
   0x8   :  { %33 = dma.hbm_to_vmem [thread:$0]  %s29_s16, 16, %s31_s20, [#allocation6]  }
   0x9   :  { %189 = dma.done.wait [#allocation3], 256  }
   0xa   :  { %190 = vsyncadd [#allocation3], 4294967040 }
   0xb   :  { %191 = dma.done.wait [#allocation6], 16  }
   0xc   :  { %192 = vsyncadd [#allocation6], 4294967280  ;;  %v42_v0 = vld [vmem:[#allocation2] sm:$0xff]  ;;  %vm46_vm0 = vcmask 261120   ;;  %v43_v2 = vld [vmem:[#allocation2 + $0x8] sm:$0xff]  ;;  %s199_s0 = smov [#allocation7]  }
   0xd   :  { %v44_v1 = vmul.f32 %v42_v0, %v42_v0  ;;  %v45_v4 = vmul.f32 %v43_v2, %v43_v2  ;;  %v112_v20 = vld [vmem:[#allocation5] ss:$0 sm:$0xff]  ;;  %s91_s1 = sshll.u32 %s199_s0, 4  ;;  %s93_s23 = sshll.u32 %s236_s2, 4  ;;  %s92_s1 = int_to_ptr.vmem [resolvable:$true] %s91_s1  ;;  %s94_s23 = int_to_ptr.hbm [resolvable:$true] %s93_s23 }
   0xf   :  { %v47_v3 = vsel %vm46_vm0, %v44_v1, 0.0  ;;  %v50_v5 = vsel %vm46_vm0, %v45_v4, 0.0 }
  0x10   :  { %48 = vadd.xlane.f32.xlu0 %v47_v3 }
  0x18   :  { %51 = vadd.xlane.f32.xlu0 %v50_v5 }
  0x83   :  { %v49_v6 = vpop.xlane.xlu0 %48 }
  0x84   :  { %v53_v7 = vmul.f32 0.03125, %v49_v6 }
  0x86   :  { %v55_v8 = vadd.f32 1e-06, %v53_v7 }
  0x88   :  { %113 = vrsqrt.f32 %v55_v8  ;;  %vm63_vm2 = vweird.f32 %v55_v8 }
  0x8b   :  { %v52_v9 = vpop.xlane.xlu0 %51 }
  0x8c   :  { %v54_v10 = vmul.f32 0.03125, %v52_v9 }
  0x8e   :  { %v114_v11 = vpop.eup %113  ;;  %v56_v12 = vadd.f32 1e-06, %v54_v10 }
  0x8f   :  { %v58_v13 = vmul.f32 %v114_v11, %v55_v8  ;;  %vm64_vm1 = vweird.f32 %v114_v11 }
  0x90   :  { %115 = vrsqrt.f32 %v56_v12  ;;  %vm65_vm3 = vmor %vm63_vm2, %vm64_vm1  ;;  %vm73_vm5 = vweird.f32 %v56_v12 }
  0x91   :  { %v59_v14 = vmul.f32 %v114_v11, %v58_v13 }
  0x93   :  { %v60_v15 = vmul.f32 0.5, %v59_v14 }
  0x95   :  { %v61_v16 = vsub.f32 1.5, %v60_v15 }
  0x96   :  { %v116_v17 = vpop.eup %115 }
  0x97   :  { %v62_v18 = vmul.f32 %v114_v11, %v61_v16  ;;  %v68_v19 = vmul.f32 %v116_v17, %v56_v12  ;;  %vm74_vm4 = vweird.f32 %v116_v17 }
  0x98   :  { %vm75_vm6 = vmor %vm73_vm5, %vm74_vm4 }
  0x99   :  { %v66_v21 = vsel %vm65_vm3, %v114_v11, %v62_v18  ;;  %v69_v22 = vmul.f32 %v116_v17, %v68_v19 }
  0x9a   :  { %v77_v23 = vmul.f32 %v66_v21, %v42_v0 }
  0x9b   :  { %v70_v24 = vmul.f32 0.5, %v69_v22 }
  0x9c   :  { %v83_v25 = vmul.f32 %v112_v20, %v77_v23 }
  0x9d   :  { %v71_v26 = vsub.f32 1.5, %v70_v24 }
  0x9e   :  { %85 = vst.msk [vmem:[#allocation7] sm:$0xff] %vm46_vm0, %v83_v25 }
  0x9f   :  { %v72_v27 = vmul.f32 %v116_v17, %v71_v26 }
  0xa1   :  { %v76_v28 = vsel %vm75_vm6, %v116_v17, %v72_v27 }
  0xa2   :  { %v78_v29 = vmul.f32 %v76_v28, %v43_v2 }
  0xa4   :  { %v84_v30 = vmul.f32 %v112_v20, %v78_v29 }
  0xa6   :  { %86 = vst.msk [vmem:[#allocation7 + $0x8] sm:$0xff] %vm46_vm0, %v84_v30 }
  0xa7   :  { %99 = dma.vmem_to_hbm [thread:$0]  %s92_s1, 256, %s94_s23, [#allocation4], %s196_s17, %s196_s17, %s197_s18  }
  0xa8   :  { %193 = dma.done.wait [#allocation4], 256  }
  0xa9   :  { %194 = vsyncadd [#allocation4], 4294967040 }
  0xaa   :  { %104 = vsyncpa [#allocation3], 1 }
  0xab   :  { %105 = vsyncpa [#allocation6], 1 }
  0xac   :  { %106 = vsyncpa [#allocation4], 1 }

</bundles_post_ra>
